<compile_context>
chip_gen: v7x
topology: tpu7x:2x2x1
jax: 0.10.0
libtpu: 0.0.40
codegen_flags: <defaults>
</compile_context>

<pallas_src>
import math
import functools

import jax
import jax.numpy as jnp
from jax.experimental import pallas as pl
from jax.experimental.pallas import tpu as pltpu

NEG_INF = -1e30            # large finite mask value (avoids inf - inf -> NaN)
_MIB = 1024 * 1024


def _min_sublane(dtype):
    """Minimum second-to-last tile size that keeps vregs fully packed."""
    return {4: 8, 2: 16, 1: 32}.get(jnp.dtype(dtype).itemsize, 8)


def _pick_tile(dim, candidates, min_tile=8):
    """Largest candidate >= min_tile that evenly divides `dim`; else the full
    dim (block == full array dim is always a legal single-block layout)."""
    for c in candidates:
        if min_tile <= c <= dim and dim % c == 0:
            return c
    return dim


def _vmem_limit(estimate_bytes):
    """2x headroom over the double-buffered tile footprint, clamped to a range
    that is safe on v7x (64 MiB/TC) without starving v5e/v6e."""
    return int(min(max(2 * estimate_bytes, 16 * _MIB), 64 * _MIB))


# --------------------------------------------------------------------------
# Tiled linear kernel: out = x @ w + b   (x: (M, K), w: (K, N), b: (1, N))
# --------------------------------------------------------------------------
def _linear_kernel(x_ref, w_ref, b_ref, o_ref, acc_ref):
    k = pl.program_id(2)

    @pl.when(k == 0)
    def _init():
        acc_ref[...] = jnp.zeros(acc_ref.shape, acc_ref.dtype)

    # Operands stay in the input dtype; f32 accumulation on the MXU.
    acc_ref[...] += jnp.dot(x_ref[...], w_ref[...],
                            preferred_element_type=jnp.float32)

    @pl.when(k == pl.num_programs(2) - 1)
    def _store():
        o_ref[...] = (acc_ref[...] +
                      b_ref[...].astype(jnp.float32)).astype(o_ref.dtype)


def _linear(x, w, b):
    M, K = x.shape
    Kw, N = w.shape
    assert K == Kw
    itemsize = jnp.dtype(x.dtype).itemsize
    tm = _pick_tile(M, (512, 256, 128, 64, 32, 16, 8), _min_sublane(x.dtype))
    tn = _pick_tile(N, (512, 256, 128), 128)
    tk = _pick_tile(K, (512, 256, 128), 128)
    grid = (M // tm, N // tn, K // tk)

    cost = pl.CostEstimate(
        flops=2 * M * N * K,
        transcendentals=0,
        # x is re-read once per N-tile pass, w once per M-tile pass.
        bytes_accessed=int((M * K * (N // tn) + K * N * (M // tm) + N + M * N)
                           * itemsize))
    vmem = _vmem_limit(
        2 * (tm * tk + tk * tn + tn + tm * tn) * itemsize + tm * tn * 4)

    return pl.pallas_call(
        _linear_kernel,
        out_shape=jax.ShapeDtypeStruct((M, N), x.dtype),
        grid_spec=pltpu.PrefetchScalarGridSpec(
            num_scalar_prefetch=0,
            grid=grid,
            in_specs=[
                pl.BlockSpec((tm, tk), lambda i, j, k: (i, k)),
                pl.BlockSpec((tk, tn), lambda i, j, k: (k, j)),
                pl.BlockSpec((1, tn), lambda i, j, k: (0, j)),
            ],
            out_specs=pl.BlockSpec((tm, tn), lambda i, j, k: (i, j)),
            scratch_shapes=[pltpu.VMEM((tm, tn), jnp.float32)],
        ),
        compiler_params=pltpu.CompilerParams(
            dimension_semantics=("parallel", "parallel", "arbitrary"),
            vmem_limit_bytes=vmem),
        cost_estimate=cost,
    )(x, w, b.reshape(1, N))


# --------------------------------------------------------------------------
# Causal flash-attention kernel, triangular grid (B, H, nt*(nt+1)/2)
# --------------------------------------------------------------------------
def _flash_attn_kernel(qi_ref, ki_ref, q_ref, k_ref, v_ref, o_ref,
                       q_scr, m_scr, l_scr, acc_scr, *, sm_scale):
    t = pl.program_id(2)
    qi = qi_ref[t]
    ki = ki_ref[t]

    @pl.when(ki == 0)
    def _init():
        # Hoisted: scale q once per q tile, not once per kv step.
        q_scr[...] = (q_ref[...] * sm_scale).astype(q_scr.dtype)
        m_scr[...] = jnp.full(m_scr.shape, NEG_INF, jnp.float32)
        l_scr[...] = jnp.zeros(l_scr.shape, jnp.float32)
        acc_scr[...] = jnp.zeros(acc_scr.shape, jnp.float32)

    def _update(apply_mask):
        k = k_ref[...]
        v = v_ref[...]
        # (q / sqrt(D)) @ k.T, f32 accumulation on the MXU.
        s = jax.lax.dot_general(q_scr[...], k, (((1,), (1,)), ((), ())),
                                preferred_element_type=jnp.float32)
        if apply_mask:
            # Diagonal tile: rows and cols share the same global offset, so the
            # causal mask is purely local.
            row = jax.lax.broadcasted_iota(jnp.int32, s.shape, 0)
            col = jax.lax.broadcasted_iota(jnp.int32, s.shape, 1)
            s = jnp.where(col <= row, s, NEG_INF)

        m_prev = m_scr[...]
        m_new = jnp.maximum(m_prev, jnp.max(s, axis=-1, keepdims=True))
        alpha = jnp.exp(m_prev - m_new)
        p = jnp.exp(s - m_new)
        l_scr[...] = alpha * l_scr[...] + jnp.sum(p, axis=-1, keepdims=True)
        acc_scr[...] = alpha * acc_scr[...] + jax.lax.dot_general(
            p.astype(v.dtype), v, (((1,), (0,)), ((), ())),
            preferred_element_type=jnp.float32)
        m_scr[...] = m_new

    # The triangular grid only emits ki <= qi: strictly-below-diagonal tiles
    # need no mask; the diagonal tile is masked and also finalizes the row.
    @pl.when(ki < qi)
    def _interior():
        _update(apply_mask=False)

    @pl.when(ki == qi)
    def _diag_and_finalize():
        _update(apply_mask=True)
        inv_l = pl.reciprocal(l_scr[...], approx=False)   # once per q tile
        o_ref[...] = (acc_scr[...] * inv_l).astype(o_ref.dtype)


def _tri_tables(nt):
    """Lower triangle of an (nt, nt) tile grid, kv index fastest-varying."""
    qs, ks = [], []
    for i in range(nt):
        for j in range(i + 1):
            qs.append(i)
            ks.append(j)
    return jnp.asarray(qs, jnp.int32), jnp.asarray(ks, jnp.int32)


def _attn_cost(B, H, T, D, nt, itemsize):
    # ~0.5x for causality on both matmul flops and the exp() count; K and V are
    # each re-read ~(nt+1)/2 times by the q-tile loop.
    return pl.CostEstimate(
        flops=2 * B * H * T * T * D,
        transcendentals=B * H * T * T // 2,
        bytes_accessed=int(B * H * T * D * itemsize * (2 + (nt + 1))))


def _attn_pallas_call(block_t, D, dtype, grid, in_specs, out_specs, out_shape,
                      cost):
    itemsize = jnp.dtype(dtype).itemsize
    kernel = functools.partial(_flash_attn_kernel, sm_scale=1.0 / math.sqrt(D))
    scratch = [
        pltpu.VMEM((block_t, D), dtype),          # scaled q (hoisted)
        pltpu.VMEM((block_t, 1), jnp.float32),    # running max
        pltpu.VMEM((block_t, 1), jnp.float32),    # running denom
        pltpu.VMEM((block_t, D), jnp.float32),    # output accumulator
    ]
    vmem = _vmem_limit(2 * 4 * block_t * D * itemsize     # q,k,v,o dbl-buffered
                       + block_t * D * (itemsize + 4) + 2 * block_t * 4)
    return pl.pallas_call(
        kernel,
        out_shape=out_shape,
        grid_spec=pltpu.PrefetchScalarGridSpec(
            num_scalar_prefetch=2,
            grid=grid,
            in_specs=in_specs,
            out_specs=out_specs,
            scratch_shapes=scratch),
        compiler_params=pltpu.CompilerParams(
            dimension_semantics=("parallel", "parallel", "arbitrary"),
            vmem_limit_bytes=vmem),
        cost_estimate=cost)


def _flash_attention_bhtd(q, k, v):
    """q, k, v: (B, H, T, D) -> (B, H, T, D), causal."""
    B, H, T, D = q.shape
    block_t = _pick_tile(T, (128, 64, 32, 16, 8), _min_sublane(q.dtype))
    nt = T // block_t
    qi_tab, ki_tab = _tri_tables(nt)
    grid = (B, H, nt * (nt + 1) // 2)

    q_map = lambda b, h, t, qt, kt: (b, h, qt[t], 0)
    kv_map = lambda b, h, t, qt, kt: (b, h, kt[t], 0)
    in_specs = [
        pl.BlockSpec((None, None, block_t, D), q_map),
        pl.BlockSpec((None, None, block_t, D), kv_map),
        pl.BlockSpec((None, None, block_t, D), kv_map),
    ]
    out_specs = pl.BlockSpec((None, None, block_t, D), q_map)
    cost = _attn_cost(B, H, T, D, nt, jnp.dtype(q.dtype).itemsize)
    call = _attn_pallas_call(block_t, D, q.dtype, grid, in_specs, out_specs,
                             jax.ShapeDtypeStruct((B, H, T, D), q.dtype), cost)
    return call(qi_tab, ki_tab, q, k, v)


def _flash_attention_fused(qkv, n_head):
    """qkv: (B, T, 3C) -> y: (B, T, C), causal.  Requires head_dim % 128 == 0
    so the per-head (block_t, D) blocks are (8, 128)-aligned; no head split /
    merge transposes are needed around the kernel."""
    B, T, C3 = qkv.shape
    C = C3 // 3
    H = n_head
    D = C // H
    assert D % 128 == 0
    block_t = _pick_tile(T, (128, 64, 32, 16, 8), _min_sublane(qkv.dtype))
    nt = T // block_t
    qi_tab, ki_tab = _tri_tables(nt)
    grid = (B, H, nt * (nt + 1) // 2)

    # Last-dim block index selects (section, head): q -> h, k -> H+h, v -> 2H+h.
    q_map = lambda b, h, t, qt, kt: (b, qt[t], h)
    k_map = lambda b, h, t, qt, kt: (b, kt[t], h + H)
    v_map = lambda b, h, t, qt, kt: (b, kt[t], h + 2 * H)
    o_map = lambda b, h, t, qt, kt: (b, qt[t], h)

    in_specs = [
        pl.BlockSpec((None, block_t, D), q_map),
        pl.BlockSpec((None, block_t, D), k_map),
        pl.BlockSpec((None, block_t, D), v_map),
    ]
    out_specs = pl.BlockSpec((None, block_t, D), o_map)
    cost = _attn_cost(B, H, T, D, nt, jnp.dtype(qkv.dtype).itemsize)
    call = _attn_pallas_call(block_t, D, qkv.dtype, grid, in_specs, out_specs,
                             jax.ShapeDtypeStruct((B, T, C), qkv.dtype), cost)
    return call(qi_tab, ki_tab, qkv, qkv, qkv)


# --------------------------------------------------------------------------
# Full module forward
# --------------------------------------------------------------------------
def causal_self_attention(x, w_attn, b_attn, w_proj, b_proj, n_head):
    """x: (B, T, C). w_attn: (C, 3C), b_attn: (3C,), w_proj: (C, C), b_proj: (C,).

    Returns (y, (k_present, v_present)) matching the PyTorch module with
    attn_mask=None, layer_past=None, is_causal=True, eval mode.
    """
    B, T, C = x.shape
    H = n_head
    D = C // H
    assert C % H == 0

    # c_attn projection -> lane-dense (B, T, 3C) slab.
    qkv = _linear(x.reshape(B * T, C), w_attn, b_attn).reshape(B, T, 3 * C)

    # `present` must be (B, H, T, D) per the module contract, so these k/v
    # transposes are mandatory output formatting, not attention plumbing.
    def to_bhtd(t2):
        return t2.reshape(B, T, H, D).transpose(0, 2, 1, 3)

    k_present = to_bhtd(qkv[..., C:2 * C])
    v_present = to_bhtd(qkv[..., 2 * C:])

    if D % 128 == 0:
        # Transpose-free attention: reads q/k/v straight out of the qkv slab
        # and writes (B, T, C) directly.
        y = _flash_attention_fused(qkv, H).reshape(B * T, C)
    else:
        # Small head dims: a (B, T, H, D)-layout block would violate the
        # (8, 128) last-two-dims constraint, so use the (B, H, T, D) layout
        # (k/v reuse the tensors already needed for `present`).
        q = to_bhtd(qkv[..., :C])
        y = _flash_attention_bhtd(q, k_present, v_present)
        y = y.transpose(0, 2, 1, 3).reshape(B * T, C)

    out = _linear(y, w_proj, b_proj).reshape(B, T, C)
    # TODO(synk): attn/resid dropout not implemented (identity; eval / p=0.0).
    return out, (k_present, v_present)


# --------------------------------------------------------------------------
# Pure-JAX reference (mirrors the PyTorch forward in eval mode)
# --------------------------------------------------------------------------
def _reference(x, w_attn, b_attn, w_proj, b_proj, n_head):
    B, T, C = x.shape
    H = n_head
    D = C // H
    qkv = x @ w_attn + b_attn
    q, k, v = qkv[..., :C], qkv[..., C:2 * C], qkv[..., 2 * C:]
    q = q.reshape(B, T, H, D).transpose(0, 2, 1, 3)
    k = k.reshape(B, T, H, D).transpose(0, 2, 1, 3)
    v = v.reshape(B, T, H, D).transpose(0, 2, 1, 3)
    att = jnp.einsum('bhtd,bhsd->bhts', q, k) / math.sqrt(D)
    mask = jnp.tril(jnp.ones((T, T), dtype=bool))
    att = jnp.where(mask[None, None], att, -jnp.inf)
    att = jax.nn.softmax(att, axis=-1)
    y = jnp.einsum('bhts,bhsd->bhtd', att, v)
    y = y.transpose(0, 2, 1, 3).reshape(B, T, C)
    y = y @ w_proj + b_proj
    return y, (k, v)


if __name__ == "__main__":
    # Small shapes consistent with the module: B=2, T=8, C=32, n_head=4.
    B, T, C = 2, 8, 32
    n_head = 4
    dtype = jnp.float32

    key = jax.random.PRNGKey(0)
    kx, k1, k2, k3, k4 = jax.random.split(key, 5)

    x = jax.random.normal(kx, (B, T, C), dtype=dtype)

    # nn.Linear(n_embd, 3*n_embd): weight stored transposed as (C, 3C).
    bound = 1.0 / math.sqrt(C)
    w_attn = jax.random.uniform(k1, (C, 3 * C), dtype=dtype,
                                minval=-bound, maxval=bound)
    b_attn = jax.random.uniform(k2, (3 * C,), dtype=dtype,
                                minval=-bound, maxval=bound)
    w_proj = jax.random.uniform(k3, (C, C), dtype=dtype,
                                minval=-bound, maxval=bound)
    b_proj = jax.random.uniform(k4, (C,), dtype=dtype,
                                minval=-bound, maxval=bound)

    y, (k_present, v_present) = causal_self_attention(
        x, w_attn, b_attn, w_proj, b_proj, n_head)
    jax.block_until_ready((y, k_present, v_present))

    y_ref, (k_ref, v_ref) = _reference(x, w_attn, b_attn, w_proj, b_proj, n_head)

    assert jnp.allclose(k_present, k_ref, atol=1e-4, rtol=1e-4)
    assert jnp.allclose(v_present, v_ref, atol=1e-4, rtol=1e-4)
    assert jnp.allclose(y, y_ref, atol=1e-3, rtol=1e-3)

    print("KERNEL_OK")
</pallas_src>

<mosaic_0001>
module attributes {stable_mosaic.version = 11 : i64} {
  func.func @_linear_kernel(%arg0: i32, %arg1: i32, %arg2: i32, %arg3: memref<16x32xf32, #tpu.memory_space<vmem>>, %arg4: memref<32x96xf32, #tpu.memory_space<vmem>>, %arg5: memref<1x96xf32, #tpu.memory_space<vmem>>, %arg6: memref<16x96xf32, #tpu.memory_space<vmem>>, %arg7: memref<16x96xf32, #tpu.memory_space<vmem>>) attributes {dimension_semantics = [#tpu.dimension_semantics<parallel>, #tpu.dimension_semantics<parallel>, #tpu.dimension_semantics<arbitrary>], iteration_bounds = array<i64: 1, 1, 1>, scalar_prefetch = 0 : i64, scratch_operands = 1 : i64, tpu.core_type = #tpu.core_type<tc>, window_params = [{transform_indices = @transform_0, window_bounds = array<i64: 16, 32>}, {transform_indices = @transform_1, window_bounds = array<i64: 32, 96>}, {transform_indices = @transform_2, window_bounds = array<i64: 1, 96>}, {transform_indices = @transform_3, window_bounds = array<i64: 16, 96>}]} {
    %c0_i32 = arith.constant 0 : i32
    %0 = arith.cmpi eq, %arg2, %c0_i32 : i32
    %1 = arith.extui %0 : i1 to i32
    %c0_i32_0 = arith.constant 0 : i32
    %2 = arith.cmpi ne, %1, %c0_i32_0 : i32
    scf.if %2 {
      %cst_10 = arith.constant 0.000000e+00 : f32
      %12 = vector.broadcast %cst_10 : f32 to vector<16x96xf32>
      %c0_11 = arith.constant 0 : index
      %c0_12 = arith.constant 0 : index
      %13 = vector.load %arg7[%c0_11, %c0_12] : memref<16x96xf32, #tpu.memory_space<vmem>>, vector<16x96xf32>
      tpu.vector_store %arg7[%c0_11, %c0_12], %12 {strides = array<i32>} : memref<16x96xf32, #tpu.memory_space<vmem>>, vector<16x96xf32>,
    } else {
    }
    %c0 = arith.constant 0 : index
    %c0_1 = arith.constant 0 : index
    %3 = vector.load %arg7[%c0, %c0_1] : memref<16x96xf32, #tpu.memory_space<vmem>>, vector<16x96xf32>
    %c0_2 = arith.constant 0 : index
    %c0_3 = arith.constant 0 : index
    %4 = vector.load %arg3[%c0_2, %c0_3] : memref<16x32xf32, #tpu.memory_space<vmem>>, vector<16x32xf32>
    %c0_4 = arith.constant 0 : index
    %c0_5 = arith.constant 0 : index
    %5 = vector.load %arg4[%c0_4, %c0_5] : memref<32x96xf32, #tpu.memory_space<vmem>>, vector<32x96xf32>
    %cst = arith.constant dense<0.000000e+00> : vector<16x96xf32>
    %6 = tpu.matmul %4, %5, %cst {dimension_numbers = #tpu.dot_dimension_numbers<[1], [0], [0], [1], [0, 0, 1, 1], [], []>} : vector<16x32xf32>, vector<32x96xf32>, vector<16x96xf32> -> vector<16x96xf32>
    %7 = arith.addf %3, %6 : vector<16x96xf32>
    %c0_6 = arith.constant 0 : index
    %c0_7 = arith.constant 0 : index
    %8 = vector.load %arg7[%c0_6, %c0_7] : memref<16x96xf32, #tpu.memory_space<vmem>>, vector<16x96xf32>
    tpu.vector_store %arg7[%c0_6, %c0_7], %7 {strides = array<i32>} : memref<16x96xf32, #tpu.memory_space<vmem>>, vector<16x96xf32>,
    %c0_i32_8 = arith.constant 0 : i32
    %9 = arith.cmpi eq, %arg2, %c0_i32_8 : i32
    %10 = arith.extui %9 : i1 to i32
    %c0_i32_9 = arith.constant 0 : i32
    %11 = arith.cmpi ne, %10, %c0_i32_9 : i32
    scf.if %11 {
      %c0_10 = arith.constant 0 : index
      %c0_11 = arith.constant 0 : index
      %12 = vector.load %arg7[%c0_10, %c0_11] : memref<16x96xf32, #tpu.memory_space<vmem>>, vector<16x96xf32>
      %c0_12 = arith.constant 0 : index
      %c0_13 = arith.constant 0 : index
      %13 = vector.load %arg5[%c0_12, %c0_13] : memref<1x96xf32, #tpu.memory_space<vmem>>, vector<1x96xf32>
      %14 = vector.broadcast %13 : vector<1x96xf32> to vector<16x96xf32>
      %15 = arith.addf %12, %14 : vector<16x96xf32>
      %c0_14 = arith.constant 0 : index
      %c0_15 = arith.constant 0 : index
      %16 = vector.load %arg6[%c0_14, %c0_15] : memref<16x96xf32, #tpu.memory_space<vmem>>, vector<16x96xf32>
      tpu.vector_store %arg6[%c0_14, %c0_15], %15 {strides = array<i32>} : memref<16x96xf32, #tpu.memory_space<vmem>>, vector<16x96xf32>,
    } else {
    }
    return
  }
  func.func @transform_0(%arg0: i32, %arg1: i32, %arg2: i32) -> (i32, i32) {
    %c0_i32 = arith.constant 0 : i32
    return %arg0, %arg2 : i32, i32
  }
  func.func @transform_1(%arg0: i32, %arg1: i32, %arg2: i32) -> (i32, i32) {
    %c0_i32 = arith.constant 0 : i32
    return %arg2, %arg1 : i32, i32
  }
  func.func @transform_2(%arg0: i32, %arg1: i32, %arg2: i32) -> (i32, i32) {
    %c0_i32 = arith.constant 0 : i32
    %c0_i32_0 = arith.constant 0 : i32
    return %c0_i32, %arg1 : i32, i32
  }
  func.func @transform_3(%arg0: i32, %arg1: i32, %arg2: i32) -> (i32, i32) {
    %c0_i32 = arith.constant 0 : i32
    return %arg0, %arg1 : i32, i32
  }
}

</mosaic_0001>

<bundles_post_ra>
// kernel: tpu_custom_call.1
= control target key start
LH: loop header
LB: loop body
LE: loop exit
PB: predicated region body
PF: predicated region fallthrough
CT: control target
= control target key end

     0   :  { %8 = vsyncpa [#allocation4], 0  ;;  %s365_s0 = inlined_call_operand.hbm [shape: f32[16,32], index: 0, kind: input, shape index: {}]   ;;  %s366_s1 = inlined_call_operand.hbm [shape: f32[32,96], index: 1, kind: input, shape index: {}]   ;;  %s367_s2 = inlined_call_operand.vmem [shape: f32[1,96], index: 2, kind: input, shape index: {}]   ;;  %s368_s3 = inlined_call_operand.hbm [shape: f32[16,96], index: 3, kind: output, shape index: {}]  }
   0x1   :  { %9 = vsyncpa [#allocation7], 0 }
   0x2   :  { %10 = vsyncpa [#allocation5], 0  ;;  %s285_s12 = smov [#allocation3]   ;;  %s213_s16 = scalar_lea.hbm %s365_s0, 256 }
   0x3   :  { %s16_s13 = sshll.u32 %s285_s12, 4  ;;  %p214_p0 = scmp.ne.s32.totalorder %s365_s0, %s213_s16  ;;  %s17_s13 = int_to_ptr.vmem [resolvable:$true] %s16_s13 }
   0x4   :  { %p217_p1 = scmp.lt.u32.totalorder %s213_s16, %s365_s0 }
   0x6   :  { %p219_p2 = pnand %p217_p1, %p214_p0 }
   0x8   :  { %222 = shalt.err (!%p219_p2)
}
   0x9   :  { %s223_s21 = scalar_lea.vmem %s17_s13, 256  ;;  %p228_p4 = scmp.lt.s32.totalorder %s17_s13, %s17_s13 }
   0xa   :  { %p224_p3 = scmp.ne.s32.totalorder %s17_s13, %s223_s21  ;;  %p229_p5 = scmp.lt.s32.totalorder %s223_s21, %s223_s21 }
   0xc   :  { %p230_p6 = por %p229_p5, %p228_p4 }
   0xe   :  { %p231_p7 = pnand %p230_p6, %p224_p3 }
  0x10   :  { %234 = shalt.err (!%p231_p7)
}
  0x11   :  { %s286_s22 = smov 128   ;;  %s287_s23 = smov 8  }
  0x12   :  { %22 = dma.hbm_to_vmem [thread:$0]  %s365_s0, 256, %s17_s13, [#allocation4], %s286_s22, %s286_s22, %s287_s23  }
  0x13   :  { %s288_s26 = smov [#allocation6]   ;;  %s235_s30 = scalar_lea.hbm %s366_s1, 512 }
  0x14   :  { %s28_s27 = sshll.u32 %s288_s26, 4  ;;  %p236_p8 = scmp.ne.s32.totalorder %s366_s1, %s235_s30  ;;  %s29_s27 = int_to_ptr.vmem [resolvable:$true] %s28_s27 }
  0x15   :  { %p239_p9 = scmp.lt.u32.totalorder %s235_s30, %s366_s1 }
  0x17   :  { %p241_p10 = pnand %p239_p9, %p236_p8 }
  0x19   :  { %244 = shalt.err (!%p241_p10)
}
  0x1a   :  { %s245_s8 = scalar_lea.vmem %s29_s27, 512  ;;  %p250_p12 = scmp.lt.s32.totalorder %s29_s27, %s29_s27 }
  0x1b   :  { %p246_p11 = scmp.ne.s32.totalorder %s29_s27, %s245_s8  ;;  %p251_p13 = scmp.lt.s32.totalorder %s245_s8, %s245_s8 }
  0x1d   :  { %p252_p0 = por %p251_p13, %p250_p12 }
  0x1f   :  { %p253_p1 = pnand %p252_p0, %p246_p11 }
  0x21   :  { %256 = shalt.err (!%p253_p1)
}
  0x22   :  { %34 = dma.hbm_to_vmem [thread:$0]  %s366_s1, 512, %s29_s27, [#allocation7], %s286_s22, %s286_s22, %s287_s23  }
  0x23   :  { %279 = dma.done.wait [#allocation4], 256  }
  0x24   :  { %280 = vsyncadd [#allocation4], 4294967040 }
  0x25   :  { %281 = dma.done.wait [#allocation7], 512  }
  0x26   :  { %282 = vsyncadd [#allocation7], 4294966784  ;;  %vm47_vm0 = vcmask 785408   ;;  %v289_v0 = vmov 0.0   ;;  %vm58_vm1 = vcmask 261120   ;;  %v54_v1 = vld [vmem:[#allocation6] sm:$0xff] }
  0x27   :  { %49 = vst.msk [vmem:[#allocation2 + $0x8] sm:$0xff] %vm47_vm0, %v289_v0  ;;  %48 = vst.msk [vmem:[#allocation2] sm:$0xff] %vm47_vm0, %v289_v0  ;;  %v55_v2 = vld [vmem:[#allocation6 + $0x8] sm:$0xff]  ;;  %v56_v3 = vld [vmem:[#allocation6 + $0x10] sm:$0xff]  ;;  %s290_s11 = smov [#allocation8]  }
  0x28   :  { %v199_v4 = vpack.c.bf16 %v55_v2, %v54_v1  ;;  %v57_v5 = vld [vmem:[#allocation6 + $0x18] sm:$0xff]  ;;  %v52_v6 = vld [vmem:[#allocation3] sm:$0xff]  ;;  %v181_v15 = vld [vmem:[%s367_s2] ss:$0 sm:$0xff]  ;;  %s166_s12 = sshll.u32 %s290_s11, 4  ;;  %s167_s12 = int_to_ptr.vmem [resolvable:$true] %s166_s12 }
  0x29   :  { %v203_v7 = vpack.c.bf16 %v57_v5, %v56_v3  ;;  %196 = vmatprep.mubr.msk.f32.mxu0 %vm58_vm1, %v52_v6  ;;  %v53_v8 = vld [vmem:[#allocation3 + $0x8] sm:$0xff]  ;;  %s257_s13 = scalar_lea.vmem %s167_s12, 256  ;;  %p262_p3 = scmp.lt.s32.totalorder %s167_s12, %s167_s12 }
  0x2a   :  { %200 = vmatprep.subr.bf16.mxu0 %v199_v4  ;;  %p258_p2 = scmp.ne.s32.totalorder %s167_s12, %s257_s13  ;;  %p263_p4 = scmp.lt.s32.totalorder %s257_s13, %s257_s13 }
  0x2b   :  { %202 = vmatpush3.bf16.msra.mxu0 %v199_v4 }
  0x2c   :  { %204 = vmatprep.subr.bf16.mxu0 %v203_v7  ;;  %p264_p5 = por %p263_p4, %p262_p3 }
  0x2e   :  { %v51_v9 = vld [vmem:[#allocation2 + $0x8] sm:$0xff]  ;;  %v50_v10 = vld [vmem:[#allocation2] sm:$0xff]  ;;  %p265_p6 = pnand %p264_p5, %p258_p2 }
  0x2f   :  { %206 = vmatpush3.bf16.msra.mxu0 %v203_v7 }
  0x32   :  { %197 = vmatmul.mubr.msk.f32.vlgmr.msra.gmra.mrb[0].mxu0 %vm58_vm1, %v53_v8 }
 0x105   :  { %v198_v11 = vpop.f32.mrb[0].mxu0 }
 0x106   :  { %v141_v12 = vadd.f32 %v198_v11, %v51_v9  ;;  %v131_v13 = vpop.f32.mrb[1].mxu0 }
 0x107   :  { %v140_v14 = vadd.f32 %v131_v13, %v50_v10 }
 0x108   :  { %144 = vst.msk [vmem:[#allocation2 + $0x8] sm:$0xff] %vm47_vm0, %v141_v12 }
 0x109   :  { %143 = vst.msk [vmem:[#allocation2] sm:$0xff] %vm47_vm0, %v140_v14 }
 0x10f   :  { %v149_v16 = vld [vmem:[#allocation2 + $0x8] sm:$0xff] }
 0x110   :  { %v148_v17 = vld [vmem:[#allocation2] sm:$0xff]  ;;  %v158_v18 = vadd.f32 %v181_v15, %v149_v16 }
 0x111   :  { %v157_v19 = vadd.f32 %v181_v15, %v148_v17 }
 0x112   :  { %160 = vst.msk [vmem:[#allocation8 + $0x8] sm:$0xff] %vm47_vm0, %v158_v18 }
 0x113   :  { %159 = vst.msk [vmem:[#allocation8] sm:$0xff] %vm47_vm0, %v157_v19 }
 0x114   :  { %268 = shalt.err (!%p265_p6)
}
 0x115   :  { %s269_s15 = scalar_lea.hbm %s368_s3, 256 }
 0x116   :  { %p270_p7 = scmp.ne.s32.totalorder %s368_s3, %s269_s15  ;;  %p273_p8 = scmp.lt.u32.totalorder %s269_s15, %s368_s3 }
 0x118   :  { %p275_p9 = pnand %p273_p8, %p270_p7 }
 0x11a   :  { %278 = shalt.err (!%p275_p9)
}
 0x11b   :  { %172 = dma.vmem_to_hbm [thread:$0]  %s167_s12, 256, %s368_s3, [#allocation5], %s286_s22, %s286_s22, %s287_s23  }
 0x11c   :  { %283 = dma.done.wait [#allocation5], 256  }
 0x11d   :  { %284 = vsyncadd [#allocation5], 4294967040 }
 0x11e   :  { %176 = vsyncpa [#allocation4], 1 }
 0x11f   :  { %177 = vsyncpa [#allocation7], 1 }
 0x120   :  { %178 = vsyncpa [#allocation5], 1 }

</bundles_post_ra>
